<compile_context>
chip_gen: v5e
topology: v5e:2x2
jax: 0.10.0
libtpu: 0.0.40
codegen_flags: <defaults>
</compile_context>

<pallas_src>
import jax
import jax.numpy as jnp
from jax.experimental import pallas as pl
from jax.experimental.pallas import tpu as pltpu


# --------------------------------------------------------------------------
# Kernel: both Q heads in one body, one lane-packed (tile_b, 2) output.
# --------------------------------------------------------------------------
def _critic_fused_kernel(obs_ref, act_ref,
                         w1o_ref, w1a_ref, b1_ref,
                         w2_ref, b2_ref,
                         w3_ref, b3_ref,
                         q_ref):
    # Layer 1: h1 = relu(obs @ W1_obs + act @ W1_act + b1)   -> (tb, 2H)
    h1 = (jnp.dot(obs_ref[...], w1o_ref[...], preferred_element_type=jnp.float32)
          + jnp.dot(act_ref[...], w1a_ref[...], preferred_element_type=jnp.float32)
          + b1_ref[...])
    h1 = jnp.maximum(h1, 0.0)

    # Layer 2: block-diagonal (2H, 2H) -> no cross-head mixing -> (tb, 2H)
    h2 = jnp.dot(h1, w2_ref[...], preferred_element_type=jnp.float32) + b2_ref[...]
    h2 = jnp.maximum(h2, 0.0)

    # Layer 3: block-diagonal (2H, 2) -> one column per head -> (tb, 2)
    q = jnp.dot(h2, w3_ref[...], preferred_element_type=jnp.float32) + b3_ref[...]
    q_ref[...] = q.astype(q_ref.dtype)


# --------------------------------------------------------------------------
# Parameter handling
# --------------------------------------------------------------------------
def _init_q_params(key, in_dim, hidden_dim):
    """Per-head params mimicking nn.Linear shapes (weights stored as [in, out])."""
    ks = jax.random.split(key, 6)
    s1 = 1.0 / jnp.sqrt(in_dim)
    s2 = 1.0 / jnp.sqrt(hidden_dim)
    w1 = jax.random.uniform(ks[0], (in_dim, hidden_dim), jnp.float32, -s1, s1)
    b1 = jax.random.uniform(ks[1], (1, hidden_dim), jnp.float32, -s1, s1)
    w2 = jax.random.uniform(ks[2], (hidden_dim, hidden_dim), jnp.float32, -s2, s2)
    b2 = jax.random.uniform(ks[3], (1, hidden_dim), jnp.float32, -s2, s2)
    w3 = jax.random.uniform(ks[4], (hidden_dim, 1), jnp.float32, -s2, s2)
    b3 = jax.random.uniform(ks[5], (1, 1), jnp.float32, -s2, s2)
    return (w1, b1, w2, b2, w3, b3)


def fuse_critic_params(q1_params, q2_params, feature_dim):
    """Fuse the two heads' params so both heads run in one MXU pass per layer.

    Done once (outside the per-step hot path). Mathematically exact:
    block-diagonal layer-2/3 weights give zero cross-head mixing.
    """
    w1_1, b1_1, w2_1, b2_1, w3_1, b3_1 = q1_params
    w1_2, b1_2, w2_2, b2_2, w3_2, b3_2 = q2_params
    H = w2_1.shape[0]

    # Layer 1: split into obs/action rows, concat heads along the output dim.
    w1o = jnp.concatenate([w1_1[:feature_dim], w1_2[:feature_dim]], axis=1)  # (F, 2H)
    w1a = jnp.concatenate([w1_1[feature_dim:], w1_2[feature_dim:]], axis=1)  # (A, 2H)
    b1 = jnp.concatenate([b1_1, b1_2], axis=1)                               # (1, 2H)

    # Layer 2: block-diagonal (2H, 2H).
    z = jnp.zeros((H, H), w2_1.dtype)
    w2 = jnp.block([[w2_1, z], [z, w2_2]])                                   # (2H, 2H)
    b2 = jnp.concatenate([b2_1, b2_2], axis=1)                               # (1, 2H)

    # Layer 3: block-diagonal (2H, 2), one output lane per head.
    z1 = jnp.zeros((H, 1), w3_1.dtype)
    w3 = jnp.block([[w3_1, z1], [z1, w3_2]])                                 # (2H, 2)
    b3 = jnp.concatenate([b3_1, b3_2], axis=1)                               # (1, 2)

    return (w1o, w1a, b1, w2, b2, w3, b3)


# --------------------------------------------------------------------------
# Wrapper: one pallas_call, batch-tiled grid, weights VMEM-resident.
# --------------------------------------------------------------------------
def _round_up(x, m):
    return ((x + m - 1) // m) * m


def critic_forward(obs, action, fused_params, *, batch_tile=256):
    """Equivalent of Critic.forward: returns (q1, q2), each (B, 1)."""
    w1o, w1a, b1, w2, b2, w3, b3 = fused_params
    B = obs.shape[0]

    # Pick a batch tile: whole (8-padded) batch if small, else fixed tile.
    if B <= batch_tile:
        tb = _round_up(B, 8)
    else:
        tb = batch_tile
    Bp = _round_up(B, tb)
    if Bp != B:
        pad = Bp - B
        obs = jnp.pad(obs, ((0, pad), (0, 0)))
        action = jnp.pad(action, ((0, pad), (0, 0)))

    grid = (Bp // tb,)

    def x_spec(a):
        return pl.BlockSpec((tb, a.shape[1]), lambda i: (i, 0))

    def w_spec(a):
        # Constant index map -> stays resident in VMEM across batch tiles.
        return pl.BlockSpec(a.shape, lambda i: (0, 0))

    out = pl.pallas_call(
        _critic_fused_kernel,
        out_shape=jax.ShapeDtypeStruct((Bp, 2), jnp.float32),
        grid=grid,
        in_specs=[x_spec(obs), x_spec(action),
                  w_spec(w1o), w_spec(w1a), w_spec(b1),
                  w_spec(w2), w_spec(b2),
                  w_spec(w3), w_spec(b3)],
        out_specs=pl.BlockSpec((tb, 2), lambda i: (i, 0)),
        compiler_params=pltpu.CompilerParams(
            dimension_semantics=("parallel",)),
    )(obs, action, w1o, w1a, b1, w2, b2, w3, b3)

    q = out[:B]
    return q[:, 0:1], q[:, 1:2]


# --------------------------------------------------------------------------
if __name__ == "__main__":
    # Small shapes consistent with the module:
    #   feature_dim=32, action_shape=(4,), hidden_dim=32, batch=8
    batch, feature_dim, action_dim, hidden_dim = 8, 32, 4, 32
    in_dim = feature_dim + action_dim

    key = jax.random.PRNGKey(0)
    k_obs, k_act, k_q1, k_q2 = jax.random.split(key, 4)

    obs = jax.random.normal(k_obs, (batch, feature_dim), jnp.float32)
    action = jax.random.normal(k_act, (batch, action_dim), jnp.float32)

    q1_params = _init_q_params(k_q1, in_dim, hidden_dim)
    q2_params = _init_q_params(k_q2, in_dim, hidden_dim)

    # Fuse once (outside the per-step hot path).
    fused = fuse_critic_params(q1_params, q2_params, feature_dim)

    q1, q2 = critic_forward(obs, action, fused)
    jax.block_until_ready((q1, q2))

    # Pure-JAX reference check (unfused, matches the PyTorch module).
    def ref_head(x, p):
        w1, b1, w2, b2, w3, b3 = p
        h = jnp.maximum(x @ w1 + b1, 0.0)
        h = jnp.maximum(h @ w2 + b2, 0.0)
        return h @ w3 + b3

    h = jnp.concatenate([obs, action], axis=-1)
    ref_q1 = ref_head(h, q1_params)
    ref_q2 = ref_head(h, q2_params)

    assert q1.shape == (batch, 1) and q2.shape == (batch, 1)
    assert jnp.allclose(q1, ref_q1, atol=1e-5, rtol=1e-5)
    assert jnp.allclose(q2, ref_q2, atol=1e-5, rtol=1e-5)

    print("KERNEL_OK")
</pallas_src>

<mosaic_0001>
module attributes {stable_mosaic.version = 11 : i64} {
  func.func @_critic_fused_kernel(%arg0: i32, %arg1: memref<8x32xf32, #tpu.memory_space<vmem>>, %arg2: memref<8x4xf32, #tpu.memory_space<vmem>>, %arg3: memref<32x64xf32, #tpu.memory_space<vmem>>, %arg4: memref<4x64xf32, #tpu.memory_space<vmem>>, %arg5: memref<1x64xf32, #tpu.memory_space<vmem>>, %arg6: memref<64x64xf32, #tpu.memory_space<vmem>>, %arg7: memref<1x64xf32, #tpu.memory_space<vmem>>, %arg8: memref<64x2xf32, #tpu.memory_space<vmem>>, %arg9: memref<1x2xf32, #tpu.memory_space<vmem>>, %arg10: memref<8x2xf32, #tpu.memory_space<vmem>>) attributes {dimension_semantics = [#tpu.dimension_semantics<parallel>], iteration_bounds = array<i64: 1>, scalar_prefetch = 0 : i64, scratch_operands = 0 : i64, tpu.core_type = #tpu.core_type<tc>, window_params = [{transform_indices = @transform_0, window_bounds = array<i64: 8, 32>}, {transform_indices = @transform_1, window_bounds = array<i64: 8, 4>}, {pipeline_mode = #tpu.pipeline_mode<synchronous>, transform_indices = @transform_2, window_bounds = array<i64: 32, 64>}, {pipeline_mode = #tpu.pipeline_mode<synchronous>, transform_indices = @transform_3, window_bounds = array<i64: 4, 64>}, {pipeline_mode = #tpu.pipeline_mode<synchronous>, transform_indices = @transform_4, window_bounds = array<i64: 1, 64>}, {pipeline_mode = #tpu.pipeline_mode<synchronous>, transform_indices = @transform_5, window_bounds = array<i64: 64, 64>}, {pipeline_mode = #tpu.pipeline_mode<synchronous>, transform_indices = @transform_6, window_bounds = array<i64: 1, 64>}, {pipeline_mode = #tpu.pipeline_mode<synchronous>, transform_indices = @transform_7, window_bounds = array<i64: 64, 2>}, {pipeline_mode = #tpu.pipeline_mode<synchronous>, transform_indices = @transform_8, window_bounds = array<i64: 1, 2>}, {transform_indices = @transform_9, window_bounds = array<i64: 8, 2>}]} {
    %c0 = arith.constant 0 : index
    %c0_0 = arith.constant 0 : index
    %0 = vector.load %arg1[%c0, %c0_0] : memref<8x32xf32, #tpu.memory_space<vmem>>, vector<8x32xf32>
    %c0_1 = arith.constant 0 : index
    %c0_2 = arith.constant 0 : index
    %1 = vector.load %arg3[%c0_1, %c0_2] : memref<32x64xf32, #tpu.memory_space<vmem>>, vector<32x64xf32>
    %cst = arith.constant dense<0.000000e+00> : vector<8x64xf32>
    %2 = tpu.matmul %0, %1, %cst {dimension_numbers = #tpu.dot_dimension_numbers<[1], [0], [0], [1], [0, 0, 1, 1], [], []>} : vector<8x32xf32>, vector<32x64xf32>, vector<8x64xf32> -> vector<8x64xf32>
    %c0_3 = arith.constant 0 : index
    %c0_4 = arith.constant 0 : index
    %3 = vector.load %arg2[%c0_3, %c0_4] : memref<8x4xf32, #tpu.memory_space<vmem>>, vector<8x4xf32>
    %c0_5 = arith.constant 0 : index
    %c0_6 = arith.constant 0 : index
    %4 = vector.load %arg4[%c0_5, %c0_6] : memref<4x64xf32, #tpu.memory_space<vmem>>, vector<4x64xf32>
    %cst_7 = arith.constant dense<0.000000e+00> : vector<8x64xf32>
    %5 = tpu.matmul %3, %4, %cst_7 {dimension_numbers = #tpu.dot_dimension_numbers<[1], [0], [0], [1], [0, 0, 1, 1], [], []>} : vector<8x4xf32>, vector<4x64xf32>, vector<8x64xf32> -> vector<8x64xf32>
    %6 = arith.addf %2, %5 : vector<8x64xf32>
    %c0_8 = arith.constant 0 : index
    %c0_9 = arith.constant 0 : index
    %7 = vector.load %arg5[%c0_8, %c0_9] : memref<1x64xf32, #tpu.memory_space<vmem>>, vector<1x64xf32>
    %8 = vector.broadcast %7 : vector<1x64xf32> to vector<8x64xf32>
    %9 = arith.addf %6, %8 : vector<8x64xf32>
    %cst_10 = arith.constant 0.000000e+00 : f32
    %10 = vector.broadcast %cst_10 : f32 to vector<8x64xf32>
    %11 = arith.maximumf %9, %10 : vector<8x64xf32>
    %c0_11 = arith.constant 0 : index
    %c0_12 = arith.constant 0 : index
    %12 = vector.load %arg6[%c0_11, %c0_12] : memref<64x64xf32, #tpu.memory_space<vmem>>, vector<64x64xf32>
    %cst_13 = arith.constant dense<0.000000e+00> : vector<8x64xf32>
    %13 = tpu.matmul %11, %12, %cst_13 {dimension_numbers = #tpu.dot_dimension_numbers<[1], [0], [0], [1], [0, 0, 1, 1], [], []>} : vector<8x64xf32>, vector<64x64xf32>, vector<8x64xf32> -> vector<8x64xf32>
    %c0_14 = arith.constant 0 : index
    %c0_15 = arith.constant 0 : index
    %14 = vector.load %arg7[%c0_14, %c0_15] : memref<1x64xf32, #tpu.memory_space<vmem>>, vector<1x64xf32>
    %15 = vector.broadcast %14 : vector<1x64xf32> to vector<8x64xf32>
    %16 = arith.addf %13, %15 : vector<8x64xf32>
    %cst_16 = arith.constant 0.000000e+00 : f32
    %17 = vector.broadcast %cst_16 : f32 to vector<8x64xf32>
    %18 = arith.maximumf %16, %17 : vector<8x64xf32>
    %c0_17 = arith.constant 0 : index
    %c0_18 = arith.constant 0 : index
    %19 = vector.load %arg8[%c0_17, %c0_18] : memref<64x2xf32, #tpu.memory_space<vmem>>, vector<64x2xf32>
    %cst_19 = arith.constant dense<0.000000e+00> : vector<8x2xf32>
    %20 = tpu.matmul %18, %19, %cst_19 {dimension_numbers = #tpu.dot_dimension_numbers<[1], [0], [0], [1], [0, 0, 1, 1], [], []>} : vector<8x64xf32>, vector<64x2xf32>, vector<8x2xf32> -> vector<8x2xf32>
    %c0_20 = arith.constant 0 : index
    %c0_21 = arith.constant 0 : index
    %21 = vector.load %arg9[%c0_20, %c0_21] : memref<1x2xf32, #tpu.memory_space<vmem>>, vector<1x2xf32>
    %22 = vector.broadcast %21 : vector<1x2xf32> to vector<8x2xf32>
    %23 = arith.addf %20, %22 : vector<8x2xf32>
    %c0_22 = arith.constant 0 : index
    %c0_23 = arith.constant 0 : index
    %24 = vector.load %arg10[%c0_22, %c0_23] : memref<8x2xf32, #tpu.memory_space<vmem>>, vector<8x2xf32>
    tpu.vector_store %arg10[%c0_22, %c0_23], %23 {strides = array<i32>} : memref<8x2xf32, #tpu.memory_space<vmem>>, vector<8x2xf32>,
    return
  }
  func.func @transform_0(%arg0: i32) -> (i32, i32) {
    %c0_i32 = arith.constant 0 : i32
    %c0_i32_0 = arith.constant 0 : i32
    return %arg0, %c0_i32 : i32, i32
  }
  func.func @transform_1(%arg0: i32) -> (i32, i32) {
    %c0_i32 = arith.constant 0 : i32
    %c0_i32_0 = arith.constant 0 : i32
    return %arg0, %c0_i32 : i32, i32
  }
  func.func @transform_2(%arg0: i32) -> (i32, i32) {
    %c0_i32 = arith.constant 0 : i32
    %c0_i32_0 = arith.constant 0 : i32
    %c0_i32_1 = arith.constant 0 : i32
    return %c0_i32, %c0_i32_0 : i32, i32
  }
  func.func @transform_3(%arg0: i32) -> (i32, i32) {
    %c0_i32 = arith.constant 0 : i32
    %c0_i32_0 = arith.constant 0 : i32
    %c0_i32_1 = arith.constant 0 : i32
    return %c0_i32, %c0_i32_0 : i32, i32
  }
  func.func @transform_4(%arg0: i32) -> (i32, i32) {
    %c0_i32 = arith.constant 0 : i32
    %c0_i32_0 = arith.constant 0 : i32
    %c0_i32_1 = arith.constant 0 : i32
    return %c0_i32, %c0_i32_0 : i32, i32
  }
  func.func @transform_5(%arg0: i32) -> (i32, i32) {
    %c0_i32 = arith.constant 0 : i32
    %c0_i32_0 = arith.constant 0 : i32
    %c0_i32_1 = arith.constant 0 : i32
    return %c0_i32, %c0_i32_0 : i32, i32
  }
  func.func @transform_6(%arg0: i32) -> (i32, i32) {
    %c0_i32 = arith.constant 0 : i32
    %c0_i32_0 = arith.constant 0 : i32
    %c0_i32_1 = arith.constant 0 : i32
    return %c0_i32, %c0_i32_0 : i32, i32
  }
  func.func @transform_7(%arg0: i32) -> (i32, i32) {
    %c0_i32 = arith.constant 0 : i32
    %c0_i32_0 = arith.constant 0 : i32
    %c0_i32_1 = arith.constant 0 : i32
    return %c0_i32, %c0_i32_0 : i32, i32
  }
  func.func @transform_8(%arg0: i32) -> (i32, i32) {
    %c0_i32 = arith.constant 0 : i32
    %c0_i32_0 = arith.constant 0 : i32
    %c0_i32_1 = arith.constant 0 : i32
    return %c0_i32, %c0_i32_0 : i32, i32
  }
  func.func @transform_9(%arg0: i32) -> (i32, i32) {
    %c0_i32 = arith.constant 0 : i32
    %c0_i32_0 = arith.constant 0 : i32
    return %arg0, %c0_i32 : i32, i32
  }
}

</mosaic_0001>

<bundles_post_ra>
// kernel: tpu_custom_call.1
= control target key start
LH: loop header
LB: loop body
LE: loop exit
PB: predicated region body
PF: predicated region fallthrough
CT: control target
= control target key end

     0   :  { %14 = vsyncpa [#allocation3], 0  ;;  %s229_s12 = smov [#allocation2]   ;;  %s230_s14 = smov 128   ;;  %s354_s0 = inlined_call_operand.vmem [shape: f32[8,32], index: 0, kind: input, shape index: {}]   ;;  %s355_s1 = inlined_call_operand.vmem [shape: f32[8,4], index: 1, kind: input, shape index: {}]   ;;  %s356_s2 = inlined_call_operand.hbm [shape: f32[32,64], index: 2, kind: input, shape index: {}]   ;;  %s357_s3 = inlined_call_operand.vmem [shape: f32[4,64], index: 3, kind: input, shape index: {}]   ;;  %s358_s4 = inlined_call_operand.vmem [shape: f32[1,64], index: 4, kind: input, shape index: {}]   ;;  %s359_s5 = inlined_call_operand.vmem [shape: f32[64,64], index: 5, kind: input, shape index: {}]   ;;  %s360_s6 = inlined_call_operand.vmem [shape: f32[1,64], index: 6, kind: input, shape index: {}]   ;;  %s361_s7 = inlined_call_operand.vmem [shape: f32[64,2], index: 7, kind: input, shape index: {}]   ;;  %s362_s8 = inlined_call_operand.vmem [shape: f32[1,2], index: 8, kind: input, shape index: {}]   ;;  %s363_s9 = inlined_call_operand.vmem [shape: f32[8,2], index: 9, kind: output, shape index: {}]  }
   0x1   :  { %s23_s11 = sshll.u32 %s356_s2, 4  ;;  %s25_s13 = sshll.u32 %s229_s12, 4  ;;  %s24_s11 = int_to_ptr.hbm [resolvable:$true] %s23_s11  ;;  %s26_s13 = int_to_ptr.vmem [resolvable:$true] %s25_s13 }
   0x2   :  { %s231_s15 = smov 8  }
   0x3   :  { %31 = dma.hbm_to_vmem [thread:$0]  %s24_s11, 512, %s26_s13, [#allocation3], %s230_s14, %s230_s14, %s231_s15  }
   0x4   :  { %227 = dma.done.wait [#allocation3], 512  }
   0x5   :  { %228 = vsyncadd [#allocation3], 4294966784  ;;  %vm59_vm0 = vcmask 1043456   ;;  %v52_v0 = vld [vmem:[#allocation2 + $0x18] sm:$0xff]  ;;  %v51_v1 = vld [vmem:[#allocation2 + $0x10] sm:$0xff]  ;;  %vm55_vm1 = vcmask 31744  }
   0x6   :  { %99 = vmatpush.msra.mxu1 %v52_v0  ;;  %v54_v2 = vld [vmem:[%s357_s3] sm:$0xf]  ;;  %v50_v4 = vld [vmem:[#allocation2 + $0x8] sm:$0xff]  ;;  %v120_v5 = vld [vmem:[%s359_s5 + $0x38] sm:$0xff]  ;;  %vm83_vm2 = vcmask 261120   ;;  %vm125_vm3 = vcmask 523264  }
   0x7   :  { %v53_v3 = vld [vmem:[%s355_s1] sm:$0xff]  ;;  %192 = vmatpush.msk.msra.mxu0 %vm59_vm0, %v54_v2  ;;  %v119_v6 = vld [vmem:[%s359_s5 + $0x30] sm:$0xff]  ;;  %137 = vmatpush.msra.mxu2 %v120_v5  ;;  %v118_v9 = vld [vmem:[%s359_s5 + $0x28] sm:$0xff]  ;;  %vm185_vm4 = vcmask 15360  }
   0x8   :  { %100 = vmatpush.msra.mxu1 %v51_v1  ;;  %193 = vmatmul.msk.f32.vlgmr.msra.gmra.mxu0 %vm55_vm1, %v53_v3  ;;  %v49_v7 = vld [vmem:[#allocation2] sm:$0xff]  ;;  %v116_v11 = vld [vmem:[%s359_s5 + $0x18] sm:$0xff]  ;;  %v115_v12 = vld [vmem:[%s359_s5 + $0x10] sm:$0xff] }
   0x9   :  { %v48_v8 = vld [vmem:[%s354_s0] sm:$0xff]  ;;  %138 = vmatpush.msra.mxu2 %v119_v6  ;;  %v114_v13 = vld [vmem:[%s359_s5 + $0x8] sm:$0xff]  ;;  %v157_v15 = vld [vmem:[%s361_s7 + $0x38] sm:$0xff] }
   0xa   :  { %101 = vmatpush.msra.mxu1 %v50_v4  ;;  %v117_v10 = vld [vmem:[%s359_s5 + $0x20] sm:$0xff]  ;;  %v156_v16 = vld [vmem:[%s361_s7 + $0x30] sm:$0xff]  ;;  %173 = vmatpush.msra.mxu3 %v157_v15  ;;  %v155_v17 = vld [vmem:[%s361_s7 + $0x28] sm:$0xff] }
   0xb   :  { %139 = vmatpush.msra.mxu2 %v118_v9  ;;  %v113_v14 = vld [vmem:[%s359_s5] sm:$0xff]  ;;  %v153_v19 = vld [vmem:[%s361_s7 + $0x18] sm:$0xff]  ;;  %v152_v26 = vld [vmem:[%s361_s7 + $0x10] sm:$0xff] }
   0xc   :  { %102 = vmatpush.msra.mxu1 %v49_v7  ;;  %174 = vmatpush.msra.mxu3 %v156_v16  ;;  %v154_v18 = vld [vmem:[%s361_s7 + $0x20] sm:$0xff]  ;;  %v151_v27 = vld [vmem:[%s361_s7 + $0x8] sm:$0xff] }
   0xd   :  { %194 = vmatmul.msk.f32.vlgmr.msra.gmra.mxu1 %vm83_vm2, %v48_v8  ;;  %140 = vmatpush.msra.mxu2 %v117_v10  ;;  %v200_v21 = vld [vmem:[%s358_s4] ss:$0 sm:$0xff] }
   0xe   :  { %175 = vmatpush.msra.mxu3 %v155_v17  ;;  %v150_v28 = vld [vmem:[%s361_s7] sm:$0xff] }
   0xf   :  { %141 = vmatpush.msra.mxu2 %v116_v11  ;;  %v201_v29 = vld [vmem:[%s360_s6] ss:$0 sm:$0xff] }
  0x10   :  { %176 = vmatpush.msra.mxu3 %v154_v18  ;;  %v202_v33 = vld [vmem:[%s362_s8] ss:$0 sm:$0xff] }
  0x11   :  { %142 = vmatpush.msra.mxu2 %v115_v12 }
  0x12   :  { %177 = vmatpush.msra.mxu3 %v153_v19 }
  0x13   :  { %143 = vmatpush.msra.mxu2 %v114_v13 }
  0x14   :  { %178 = vmatpush.msra.mxu3 %v152_v26 }
  0x15   :  { %144 = vmatpush.msra.mxu2 %v113_v14 }
  0x16   :  { %179 = vmatpush.msra.mxu3 %v151_v27 }
  0x18   :  { %180 = vmatpush.msra.mxu3 %v150_v28 }
  0x85   :  { %v80_v20 = vpop.f32.mrf.mxu0 }
  0x8a   :  { %v104_v22 = vpop.f32.mrf.mxu1 }
  0x8b   :  { %v105_v23 = vadd.f32 %v104_v22, %v80_v20 }
  0x8d   :  { %v111_v24 = vadd.f32 %v200_v21, %v105_v23 }
  0x8f   :  { %v112_v25 = vmax.f32 %v111_v24, 0.0 }
  0x91   :  { %195 = vmatmul.msk.f32.vlgmr.msra.gmra.mxu2 %vm125_vm3, %v112_v25 }
 0x114   :  { %v146_v30 = vpop.f32.mrf.mxu2 }
 0x115   :  { %v147_v31 = vadd.f32 %v201_v29, %v146_v30 }
 0x117   :  { %v149_v32 = vmax.f32 %v147_v31, 0.0 }
 0x119   :  { %196 = vmatmul.msk.f32.vlgmr.msra.gmra.mxu3 %vm125_vm3, %v149_v32 }
 0x19c   :  { %v182_v34 = vpop.f32.mrf.mxu3 }
 0x19d   :  { %v183_v35 = vadd.f32 %v202_v33, %v182_v34 }
 0x19f   :  { %186 = vst.msk [vmem:[%s363_s9] sm:$0xff] %vm185_vm4, %v183_v35 }
 0x1a0   :  { %191 = vsyncpa [#allocation3], 1 }

</bundles_post_ra>
